<compile_context>
chip_gen: v7x
topology: tpu7x:2x2x1
jax: 0.10.0
libtpu: 0.0.40
codegen_flags: <defaults>
</compile_context>

<pallas_src>
import jax
import jax.numpy as jnp
from jax.experimental import pallas as pl
from jax.experimental.pallas import tpu as pltpu


_MULTI_DMA_MIN_BYTES = 1 << 20   # only split copies big enough to benefit
_MAX_DMA_CHUNKS = 4


def _choose_2d(total: int):
    """Lane-dense (rows, cols) factorization of `total`; widest cols first."""
    for cols in (2048, 1024, 512, 256, 128):
        if total % cols == 0:
            return total // cols, cols
    return None


def _sublane_multiple(dtype) -> int:
    """Packed-sublane row granularity: 8 (f32), 16 (bf16/f16), 32 (int8/fp8)."""
    itemsize = jnp.dtype(dtype).itemsize
    return max(8, 32 // max(1, itemsize))


def _chunk_boundaries(rows: int, row_bytes: int, dtype):
    """Static (start, size) row chunks; >1 chunk engages multiple DMA engines."""
    total_bytes = rows * row_bytes
    if rows < 2 or total_bytes < _MULTI_DMA_MIN_BYTES:
        return ((0, rows),)
    n = min(_MAX_DMA_CHUNKS, rows)
    base = rows // n
    mult = _sublane_multiple(dtype)
    if base >= mult:
        base = (base // mult) * mult
    boundaries = []
    start = 0
    for i in range(n):
        size = base if i < n - 1 else rows - start
        if size <= 0:
            break
        boundaries.append((start, size))
        start += size
    return tuple(boundaries)


def _make_dma_kernel(boundaries):
    """Build an HBM->HBM copy kernel (no VMEM round trip, no grid steps)."""

    def kernel(x_ref, o_ref, sem):
        if boundaries is None:
            cp = pltpu.make_async_copy(x_ref, o_ref, sem.at[0])
            cp.start()
            cp.wait()
            return
        copies = []
        for i, (start, size) in enumerate(boundaries):
            cp = pltpu.make_async_copy(
                x_ref.at[pl.ds(start, size), :],
                o_ref.at[pl.ds(start, size), :],
                sem.at[i],
            )
            cp.start()
            copies.append(cp)
        for cp in copies:
            cp.wait()

    return kernel


def unsqueeze(x: jax.Array, dim: int) -> jax.Array:
    """Pallas equivalent of torch.Tensor.unsqueeze(dim)."""
    ndim = x.ndim
    # torch semantics: dim may be in [-(ndim+1), ndim]
    if not (-(ndim + 1) <= dim <= ndim):
        raise ValueError(f"dim {dim} out of range for ndim {ndim}")
    if dim < 0:
        dim = dim + ndim + 1

    out_shape = x.shape[:dim] + (1,) + x.shape[dim:]

    total = x.size
    if total == 0:
        # Nothing to copy; pure metadata result.
        return jnp.reshape(x, out_shape)

    itemsize = jnp.dtype(x.dtype).itemsize
    fact = _choose_2d(total)
    if fact is None:
        # Element count with no 128 divisor: one whole-ref DMA of the array
        # as-is.  DMA is shape/layout agnostic, so no masked stores occur.
        x_src = x if ndim >= 1 else x.reshape(1)
        boundaries = None
        n_sems = 1
        copy_shape = x_src.shape
    else:
        rows, cols = fact
        x_src = x.reshape(rows, cols)       # free metadata reshape
        boundaries = _chunk_boundaries(rows, cols * itemsize, x.dtype)
        n_sems = len(boundaries)
        copy_shape = (rows, cols)

    y = pl.pallas_call(
        _make_dma_kernel(boundaries),
        out_shape=jax.ShapeDtypeStruct(copy_shape, x.dtype),
        in_specs=[pl.BlockSpec(memory_space=pl.ANY)],
        out_specs=pl.BlockSpec(memory_space=pl.ANY),
        scratch_shapes=[pltpu.SemaphoreType.DMA((n_sems,))],
    )(x_src)

    # Insert the unit axis as metadata only — after the copy, never inside the
    # kernel's minor (sublane, lane) dims.
    return y.reshape(out_shape)


if __name__ == "__main__":
    key = jax.random.PRNGKey(0)

    # NCHW-style input, as a conv layer upstream of Unsqueeze would produce.
    x = jax.random.normal(key, (2, 4, 16, 16), dtype=jnp.float32)

    # dim=1 (module is constructed with a fixed dim)
    y = jax.block_until_ready(unsqueeze(x, 1))
    assert y.shape == (2, 1, 4, 16, 16), y.shape
    assert y.dtype == x.dtype
    assert jnp.array_equal(y, jnp.expand_dims(x, 1))

    # Negative / trailing dim (unit axis stays out of the kernel's minor dims).
    y_neg = jax.block_until_ready(unsqueeze(x, -1))
    assert y_neg.shape == (2, 4, 16, 16, 1), y_neg.shape
    assert jnp.array_equal(y_neg, jnp.expand_dims(x, -1))

    # Leading dim.
    y0 = jax.block_until_ready(unsqueeze(x, 0))
    assert y0.shape == (1, 2, 4, 16, 16), y0.shape
    assert jnp.array_equal(y0, jnp.expand_dims(x, 0))

    # bf16 (packed sublanes) large enough to exercise the multi-chunk
    # (multi-DMA-engine) path with dtype-aware chunk rounding.
    xb = jax.random.normal(key, (2, 4, 256, 512), dtype=jnp.bfloat16)
    yb = jax.block_until_ready(unsqueeze(xb, 2))
    assert yb.shape == (2, 4, 1, 256, 512), yb.shape
    assert jnp.array_equal(yb, jnp.expand_dims(xb, 2))

    # Awkward element count (not a multiple of 128): whole-ref single-DMA path.
    xo = jax.random.normal(key, (3, 5, 7), dtype=jnp.float32)
    yo = jax.block_until_ready(unsqueeze(xo, 1))
    assert yo.shape == (3, 1, 5, 7), yo.shape
    assert jnp.array_equal(yo, jnp.expand_dims(xo, 1))

    print("KERNEL_OK")
</pallas_src>

<mosaic_0001>
module attributes {stable_mosaic.version = 11 : i64} {
  func.func @kernel(%arg0: memref<1x2048xf32, #tpu.memory_space<any>>, %arg1: memref<1x2048xf32, #tpu.memory_space<any>>, %arg2: memref<1x!tpu.dma_semaphore, #tpu.memory_space<semaphore_mem>>) attributes {dimension_semantics = [], scalar_prefetch = 0 : i64, scratch_operands = 1 : i64, tpu.core_type = #tpu.core_type<tc>} {
    %c0_i32 = arith.constant 0 : i32
    %c0_i32_0 = arith.constant 0 : i32
    %c0_i32_1 = arith.constant 0 : i32
    %0 = tpu.memref_slice %arg0[%c0_i32_0, %c0_i32_1] : memref<1x2048xf32, #tpu.memory_space<any>> -> memref<1x2048xf32, #tpu.memory_space<any>>
    %c0_i32_2 = arith.constant 0 : i32
    %c0_i32_3 = arith.constant 0 : i32
    %1 = tpu.memref_slice %arg1[%c0_i32_2, %c0_i32_3] : memref<1x2048xf32, #tpu.memory_space<any>> -> memref<1x2048xf32, #tpu.memory_space<any>>
    %2 = tpu.memref_slice %arg2[%c0_i32] : memref<1x!tpu.dma_semaphore, #tpu.memory_space<semaphore_mem>> -> memref<1x!tpu.dma_semaphore, #tpu.memory_space<semaphore_mem>>
    %3 = tpu.memref_squeeze %2 : memref<1x!tpu.dma_semaphore, #tpu.memory_space<semaphore_mem>> -> memref<!tpu.dma_semaphore, #tpu.memory_space<semaphore_mem>>
    tpu.enqueue_dma source(%0 : memref<1x2048xf32, #tpu.memory_space<any>>) target(%1 : memref<1x2048xf32, #tpu.memory_space<any>>) target_semaphore(%3 : memref<!tpu.dma_semaphore, #tpu.memory_space<semaphore_mem>>)
    %c0_i32_4 = arith.constant 0 : i32
    %c0_i32_5 = arith.constant 0 : i32
    %c0_i32_6 = arith.constant 0 : i32
    %4 = tpu.memref_slice %arg0[%c0_i32_5, %c0_i32_6] : memref<1x2048xf32, #tpu.memory_space<any>> -> memref<1x2048xf32, #tpu.memory_space<any>>
    %c0_i32_7 = arith.constant 0 : i32
    %c0_i32_8 = arith.constant 0 : i32
    %5 = tpu.memref_slice %arg1[%c0_i32_7, %c0_i32_8] : memref<1x2048xf32, #tpu.memory_space<any>> -> memref<1x2048xf32, #tpu.memory_space<any>>
    %6 = tpu.memref_slice %arg2[%c0_i32_4] : memref<1x!tpu.dma_semaphore, #tpu.memory_space<semaphore_mem>> -> memref<1x!tpu.dma_semaphore, #tpu.memory_space<semaphore_mem>>
    %7 = tpu.memref_squeeze %6 : memref<1x!tpu.dma_semaphore, #tpu.memory_space<semaphore_mem>> -> memref<!tpu.dma_semaphore, #tpu.memory_space<semaphore_mem>>
    tpu.wait_dma2 semaphore(%7 : memref<!tpu.dma_semaphore, #tpu.memory_space<semaphore_mem>>) src(%4 : memref<1x2048xf32, #tpu.memory_space<any>>) dst(%5 : memref<1x2048xf32, #tpu.memory_space<any>>)
    return
  }
}

</mosaic_0001>

<bundles_post_ra>
// kernel: tpu_custom_call.1
= control target key start
LH: loop header
LB: loop body
LE: loop exit
PB: predicated region body
PF: predicated region fallthrough
CT: control target
= control target key end

     0   :  { %s34_s6 = smov [#allocation2]   ;;  %s35_s7 = smov [#allocation3]   ;;  %s53_s0 = inlined_call_operand.hbm [shape: f32[1,2048], index: 0, kind: input, shape index: {}]   ;;  %s54_s1 = inlined_call_operand.hbm [shape: f32[1,2048], index: 1, kind: output, shape index: {}]  }
   0x1   :  { %s36_s8 = smov 0  }
   0x2   :  { %18 = dma.general %s53_s0, 256, %s54_s1, %s34_s6, %s35_s7, [#allocation4], %s36_s8, 0  }
   0x3   :  { %32 = dma.done.wait [#allocation2], 256 }
   0x4   :  { %33 = vsyncadd [#allocation2], 4294967040 }
   0x5   :  { %22 = vsyncmov [#allocation2] }
   0x8   :  { %s23_s13 = vpop.sfrf %22 }
   0x9   :  { %p28_p0 = scmp.ne.s32.totalorder %s23_s13, 0 }
   0xb   :  { %27 = shalt.err (%p28_p0)  }

</bundles_post_ra>
